<compile_context>
chip_gen: v6e
topology: v6e:2x2x1
jax: 0.10.0
libtpu: 0.0.40
codegen_flags: <defaults>
</compile_context>

<pallas_src>
from functools import partial

import jax
import jax.numpy as jnp
from jax.experimental import pallas as pl
from jax.experimental.pallas import tpu as pltpu

LOG_STD_MAX = 2.0
LOG_STD_MIN = -5.0


def _round_up(x: int, m: int) -> int:
    return ((x + m - 1) // m) * m


def mlp_mean_kernel(obs_ref, w1_ref, b1_ref, w2_ref, b2_ref, w3_ref, b3_ref,
                    out_ref):
    # MLP: Linear -> ReLU -> Linear -> ReLU -> Linear   (one batch tile)
    # Dots accumulate in f32; bias add / ReLU are done in f32 (biases are f32
    # even when weights/activations are stored in bf16).
    x = obs_ref[...]
    h1 = jnp.dot(x, w1_ref[...], preferred_element_type=jnp.float32) + b1_ref[...]
    h1 = jnp.maximum(h1, 0.0)
    h2 = (jnp.dot(h1.astype(w2_ref.dtype), w2_ref[...],
                  preferred_element_type=jnp.float32) + b2_ref[...])
    h2 = jnp.maximum(h2, 0.0)
    mean = (jnp.dot(h2.astype(w3_ref.dtype), w3_ref[...],
                    preferred_element_type=jnp.float32) + b3_ref[...])
    out_ref[...] = mean.astype(out_ref.dtype)


@partial(jax.jit, static_argnames=("tile_b", "store_dtype"))
def gaussian_policy_forward(obs, w1, b1, w2, b2, w3, b3, log_std, *,
                            tile_b=1024, store_dtype=jnp.float32):
    """Returns (mean, scale_tril): the parameters of MultivariateNormal."""
    batch, state_dim = obs.shape
    hidden = w1.shape[1]
    act_dim = w3.shape[1]
    act_pad = _round_up(act_dim, 128)          # lane-dense output columns

    # Batch tile: multiple of 8 sublanes; for batches smaller than tile_b use
    # a single (rounded-up) tile.  Grid = cdiv(batch, tb); Pallas masks the
    # out-of-range tail rows on writeback, so no explicit batch padding.
    tb = min(_round_up(tile_b, 8), _round_up(batch, 8))
    grid = (pl.cdiv(batch, tb),)

    # Storage-dtype casts (no-ops when store_dtype == f32).  Biases stay f32.
    obs_c = obs.astype(store_dtype)
    w1_c = w1.astype(store_dtype)
    w2_c = w2.astype(store_dtype)
    # Zero-pad the last layer to 128 output columns -> unmasked lane-dense
    # stores; extra columns are sliced off below.  (Tiny weight-side pad.)
    w3_c = jnp.pad(w3, ((0, 0), (0, act_pad - act_dim))).astype(store_dtype)
    b3_p = jnp.pad(b3, ((0, 0), (0, act_pad - act_dim)))   # f32

    mean_pad = pl.pallas_call(
        mlp_mean_kernel,
        out_shape=jax.ShapeDtypeStruct((batch, act_pad), jnp.float32),
        grid=grid,
        in_specs=[
            # obs: tiled along batch.
            pl.BlockSpec((tb, state_dim), lambda i: (i, 0)),
            # weights / biases: constant index_map -> fetched once, VMEM-resident.
            pl.BlockSpec((state_dim, hidden), lambda i: (0, 0)),
            pl.BlockSpec((1, hidden), lambda i: (0, 0)),
            pl.BlockSpec((hidden, hidden), lambda i: (0, 0)),
            pl.BlockSpec((1, hidden), lambda i: (0, 0)),
            pl.BlockSpec((hidden, act_pad), lambda i: (0, 0)),
            pl.BlockSpec((1, act_pad), lambda i: (0, 0)),
        ],
        out_specs=pl.BlockSpec((tb, act_pad), lambda i: (i, 0)),
        compiler_params=pltpu.CompilerParams(
            dimension_semantics=("parallel",)),
    )(obs_c, w1_c, b1, w2_c, b2, w3_c, b3_p)

    mean = mean_pad[:, :act_dim]

    # Batch-independent scale_tril built in plain JAX (hoisted out of kernel).
    std = jnp.exp(jnp.clip(log_std, LOG_STD_MIN, LOG_STD_MAX))   # (act_dim,)
    scale_tril = jnp.diag(std)                                   # (act_dim, act_dim)
    return mean, scale_tril


def init_params(key, state_dim, hidden_dim, act_dim):
    # Deterministic synthetic init (PyTorch-style uniform fan-in bounds).
    ks = jax.random.split(key, 6)

    def linear(kw, kb, fan_in, fan_out):
        bound = 1.0 / jnp.sqrt(fan_in)
        w = jax.random.uniform(kw, (fan_in, fan_out), jnp.float32, -bound, bound)
        b = jax.random.uniform(kb, (1, fan_out), jnp.float32, -bound, bound)
        return w, b

    w1, b1 = linear(ks[0], ks[1], state_dim, hidden_dim)
    w2, b2 = linear(ks[2], ks[3], hidden_dim, hidden_dim)
    w3, b3 = linear(ks[4], ks[5], hidden_dim, act_dim)
    log_std = jnp.zeros((act_dim,), jnp.float32)   # nn.Parameter(torch.zeros(act_dim))
    return w1, b1, w2, b2, w3, b3, log_std


def reference_forward(obs, w1, b1, w2, b2, w3, b3, log_std):
    h1 = jnp.maximum(obs @ w1 + b1, 0.0)
    h2 = jnp.maximum(h1 @ w2 + b2, 0.0)
    mean = h2 @ w3 + b3
    std = jnp.exp(jnp.clip(log_std, LOG_STD_MIN, LOG_STD_MAX))
    tril = jnp.diag(std)
    return mean, tril


if __name__ == "__main__":
    # Small shapes consistent with the module: HalfCheetah-like obs/act dims.
    state_dim, hidden_dim, act_dim = 17, 32, 6

    key = jax.random.PRNGKey(0)
    k_obs, k_obs2, k_obs3, k_params = jax.random.split(key, 4)
    params = init_params(k_params, state_dim, hidden_dim, act_dim)

    # 1) Tiny batch (single small tile, grid=(1,)).
    obs = jax.random.normal(k_obs, (2, state_dim), jnp.float32)
    mean, scale_tril = gaussian_policy_forward(obs, *params)
    mean, scale_tril = jax.block_until_ready((mean, scale_tril))
    ref_mean, ref_tril = reference_forward(obs, *params)
    assert mean.shape == (2, act_dim)
    assert scale_tril.shape == (act_dim, act_dim)
    assert jnp.allclose(mean, ref_mean, atol=1e-5, rtol=1e-5)
    assert jnp.allclose(scale_tril, ref_tril, atol=1e-6, rtol=1e-6)

    # 2) Non-multiple-of-8 batch (exercises the masked tail-block writeback).
    obs2 = jax.random.normal(k_obs2, (260, state_dim), jnp.float32)
    mean2, _ = jax.block_until_ready(gaussian_policy_forward(obs2, *params))
    ref_mean2, _ = reference_forward(obs2, *params)
    assert mean2.shape == (260, act_dim)
    assert jnp.allclose(mean2, ref_mean2, atol=1e-4, rtol=1e-5)

    # 3) Multi-tile batch (grid > 1 with the 1024-row tile + partial tail).
    obs3 = jax.random.normal(k_obs3, (2100, state_dim), jnp.float32)
    mean3, _ = jax.block_until_ready(gaussian_policy_forward(obs3, *params))
    ref_mean3, _ = reference_forward(obs3, *params)
    assert mean3.shape == (2100, act_dim)
    assert jnp.allclose(mean3, ref_mean3, atol=1e-4, rtol=1e-5)

    # 4) bf16 storage path (f32 accumulate / f32 elementwise) — looser parity.
    mean_bf16, _ = jax.block_until_ready(
        gaussian_policy_forward(obs2, *params, store_dtype=jnp.bfloat16))
    assert jnp.allclose(mean_bf16, ref_mean2, atol=5e-2, rtol=5e-2)

    print("KERNEL_OK")
</pallas_src>

<mosaic_0001>
module attributes {stable_mosaic.version = 11 : i64} {
  func.func @mlp_mean_kernel(%arg0: i32, %arg1: memref<8x17xf32, #tpu.memory_space<vmem>>, %arg2: memref<17x32xf32, #tpu.memory_space<vmem>>, %arg3: memref<1x32xf32, #tpu.memory_space<vmem>>, %arg4: memref<32x32xf32, #tpu.memory_space<vmem>>, %arg5: memref<1x32xf32, #tpu.memory_space<vmem>>, %arg6: memref<32x128xf32, #tpu.memory_space<vmem>>, %arg7: memref<1x128xf32, #tpu.memory_space<vmem>>, %arg8: memref<8x128xf32, #tpu.memory_space<vmem>>) attributes {dimension_semantics = [#tpu.dimension_semantics<parallel>], iteration_bounds = array<i64: 1>, scalar_prefetch = 0 : i64, scratch_operands = 0 : i64, tpu.core_type = #tpu.core_type<tc>, window_params = [{transform_indices = @transform_0, window_bounds = array<i64: 8, 17>}, {pipeline_mode = #tpu.pipeline_mode<synchronous>, transform_indices = @transform_1, window_bounds = array<i64: 17, 32>}, {pipeline_mode = #tpu.pipeline_mode<synchronous>, transform_indices = @transform_2, window_bounds = array<i64: 1, 32>}, {pipeline_mode = #tpu.pipeline_mode<synchronous>, transform_indices = @transform_3, window_bounds = array<i64: 32, 32>}, {pipeline_mode = #tpu.pipeline_mode<synchronous>, transform_indices = @transform_4, window_bounds = array<i64: 1, 32>}, {pipeline_mode = #tpu.pipeline_mode<synchronous>, transform_indices = @transform_5, window_bounds = array<i64: 32, 128>}, {pipeline_mode = #tpu.pipeline_mode<synchronous>, transform_indices = @transform_6, window_bounds = array<i64: 1, 128>}, {transform_indices = @transform_7, window_bounds = array<i64: 8, 128>}]} {
    %c0 = arith.constant 0 : index
    %c0_0 = arith.constant 0 : index
    %0 = vector.load %arg1[%c0, %c0_0] : memref<8x17xf32, #tpu.memory_space<vmem>>, vector<8x17xf32>
    %c0_1 = arith.constant 0 : index
    %c0_2 = arith.constant 0 : index
    %1 = vector.load %arg2[%c0_1, %c0_2] : memref<17x32xf32, #tpu.memory_space<vmem>>, vector<17x32xf32>
    %cst = arith.constant dense<0.000000e+00> : vector<8x32xf32>
    %2 = tpu.matmul %0, %1, %cst {dimension_numbers = #tpu.dot_dimension_numbers<[1], [0], [0], [1], [0, 0, 1, 1], [], []>} : vector<8x17xf32>, vector<17x32xf32>, vector<8x32xf32> -> vector<8x32xf32>
    %c0_3 = arith.constant 0 : index
    %c0_4 = arith.constant 0 : index
    %3 = vector.load %arg3[%c0_3, %c0_4] : memref<1x32xf32, #tpu.memory_space<vmem>>, vector<1x32xf32>
    %4 = vector.broadcast %3 : vector<1x32xf32> to vector<8x32xf32>
    %5 = arith.addf %2, %4 : vector<8x32xf32>
    %cst_5 = arith.constant 0.000000e+00 : f32
    %6 = vector.broadcast %cst_5 : f32 to vector<8x32xf32>
    %7 = arith.maximumf %5, %6 : vector<8x32xf32>
    %c0_6 = arith.constant 0 : index
    %c0_7 = arith.constant 0 : index
    %8 = vector.load %arg4[%c0_6, %c0_7] : memref<32x32xf32, #tpu.memory_space<vmem>>, vector<32x32xf32>
    %cst_8 = arith.constant dense<0.000000e+00> : vector<8x32xf32>
    %9 = tpu.matmul %7, %8, %cst_8 {dimension_numbers = #tpu.dot_dimension_numbers<[1], [0], [0], [1], [0, 0, 1, 1], [], []>} : vector<8x32xf32>, vector<32x32xf32>, vector<8x32xf32> -> vector<8x32xf32>
    %c0_9 = arith.constant 0 : index
    %c0_10 = arith.constant 0 : index
    %10 = vector.load %arg5[%c0_9, %c0_10] : memref<1x32xf32, #tpu.memory_space<vmem>>, vector<1x32xf32>
    %11 = vector.broadcast %10 : vector<1x32xf32> to vector<8x32xf32>
    %12 = arith.addf %9, %11 : vector<8x32xf32>
    %cst_11 = arith.constant 0.000000e+00 : f32
    %13 = vector.broadcast %cst_11 : f32 to vector<8x32xf32>
    %14 = arith.maximumf %12, %13 : vector<8x32xf32>
    %c0_12 = arith.constant 0 : index
    %c0_13 = arith.constant 0 : index
    %15 = vector.load %arg6[%c0_12, %c0_13] : memref<32x128xf32, #tpu.memory_space<vmem>>, vector<32x128xf32>
    %cst_14 = arith.constant dense<0.000000e+00> : vector<8x128xf32>
    %16 = tpu.matmul %14, %15, %cst_14 {dimension_numbers = #tpu.dot_dimension_numbers<[1], [0], [0], [1], [0, 0, 1, 1], [], []>} : vector<8x32xf32>, vector<32x128xf32>, vector<8x128xf32> -> vector<8x128xf32>
    %c0_15 = arith.constant 0 : index
    %c0_16 = arith.constant 0 : index
    %17 = vector.load %arg7[%c0_15, %c0_16] : memref<1x128xf32, #tpu.memory_space<vmem>>, vector<1x128xf32>
    %18 = vector.broadcast %17 : vector<1x128xf32> to vector<8x128xf32>
    %19 = arith.addf %16, %18 : vector<8x128xf32>
    %c0_17 = arith.constant 0 : index
    %c0_18 = arith.constant 0 : index
    %20 = vector.load %arg8[%c0_17, %c0_18] : memref<8x128xf32, #tpu.memory_space<vmem>>, vector<8x128xf32>
    tpu.vector_store %arg8[%c0_17, %c0_18], %19 {strides = array<i32>} : memref<8x128xf32, #tpu.memory_space<vmem>>, vector<8x128xf32>,
    return
  }
  func.func @transform_0(%arg0: i32) -> (i32, i32) {
    %c0_i32 = arith.constant 0 : i32
    %c0_i32_0 = arith.constant 0 : i32
    return %arg0, %c0_i32 : i32, i32
  }
  func.func @transform_1(%arg0: i32) -> (i32, i32) {
    %c0_i32 = arith.constant 0 : i32
    %c0_i32_0 = arith.constant 0 : i32
    %c0_i32_1 = arith.constant 0 : i32
    return %c0_i32, %c0_i32_0 : i32, i32
  }
  func.func @transform_2(%arg0: i32) -> (i32, i32) {
    %c0_i32 = arith.constant 0 : i32
    %c0_i32_0 = arith.constant 0 : i32
    %c0_i32_1 = arith.constant 0 : i32
    return %c0_i32, %c0_i32_0 : i32, i32
  }
  func.func @transform_3(%arg0: i32) -> (i32, i32) {
    %c0_i32 = arith.constant 0 : i32
    %c0_i32_0 = arith.constant 0 : i32
    %c0_i32_1 = arith.constant 0 : i32
    return %c0_i32, %c0_i32_0 : i32, i32
  }
  func.func @transform_4(%arg0: i32) -> (i32, i32) {
    %c0_i32 = arith.constant 0 : i32
    %c0_i32_0 = arith.constant 0 : i32
    %c0_i32_1 = arith.constant 0 : i32
    return %c0_i32, %c0_i32_0 : i32, i32
  }
  func.func @transform_5(%arg0: i32) -> (i32, i32) {
    %c0_i32 = arith.constant 0 : i32
    %c0_i32_0 = arith.constant 0 : i32
    %c0_i32_1 = arith.constant 0 : i32
    return %c0_i32, %c0_i32_0 : i32, i32
  }
  func.func @transform_6(%arg0: i32) -> (i32, i32) {
    %c0_i32 = arith.constant 0 : i32
    %c0_i32_0 = arith.constant 0 : i32
    %c0_i32_1 = arith.constant 0 : i32
    return %c0_i32, %c0_i32_0 : i32, i32
  }
  func.func @transform_7(%arg0: i32) -> (i32, i32) {
    %c0_i32 = arith.constant 0 : i32
    %c0_i32_0 = arith.constant 0 : i32
    return %arg0, %c0_i32 : i32, i32
  }
}

</mosaic_0001>

<bundles_post_ra>
// kernel: gaussian_policy_forward.1
= control target key start
LH: loop header
LB: loop body
LE: loop exit
PB: predicated region body
PF: predicated region fallthrough
CT: control target
= control target key end

     0   :  { %12 = vsyncpa [#allocation3], 0  ;;  %vm42_vm0 = vcmask 1040384   ;;  %v383_v1 = vmov 0.0   ;;  %vm384_vm1 = vmmov 0   ;;  %vm38_vm2 = vcmask 138240   ;;  %s478_s0 = inlined_call_operand.vmem [shape: f32[2,17], index: 0, kind: input, shape index: {}]   ;;  %s479_s1 = inlined_call_operand.vmem [shape: f32[17,32], index: 1, kind: input, shape index: {}]   ;;  %s480_s2 = inlined_call_operand.vmem [shape: f32[1,32], index: 2, kind: input, shape index: {}]   ;;  %s481_s3 = inlined_call_operand.vmem [shape: f32[32,32], index: 3, kind: input, shape index: {}]   ;;  %s482_s4 = inlined_call_operand.vmem [shape: f32[1,32], index: 4, kind: input, shape index: {}]   ;;  %s483_s5 = inlined_call_operand.vmem [shape: f32[32,128], index: 5, kind: input, shape index: {}]   ;;  %s484_s6 = inlined_call_operand.vmem [shape: f32[1,128], index: 6, kind: input, shape index: {}]   ;;  %s485_s7 = inlined_call_operand.hbm [shape: f32[2,128], index: 7, kind: output, shape index: {}]  }
   0x1   :  { %v30_v0 = vld [vmem:[%s479_s1 + $0x10] sm:$0x1]  ;;  %325 = vmatprep.subr.mxu0 %v383_v1  ;;  %v29_v2 = vld [vmem:[%s479_s1 + $0x8] sm:$0xff]  ;;  %334 = vmatprep.subr.mxu1 %v383_v1  ;;  %v120_v3 = vld [vmem:[%s481_s3 + $0x18] sm:$0xff]  ;;  %vm128_vm3 = vcmask 261120  }
   0x2   :  { %326 = vmatpush3.msk.msra.mxu0 %vm42_vm0, %v30_v0  ;;  %331 = vmatprep.mubr.msk.f32.mxu0 %vm384_vm1, %v383_v1  ;;  %v28_v4 = vld [vmem:[%s479_s1] sm:$0xff]  ;;  %v119_v6 = vld [vmem:[%s481_s3 + $0x10] sm:$0xff]  ;;  %v118_v7 = vld [vmem:[%s481_s3 + $0x8] sm:$0xff] }
   0x3   :  { %327 = vmatprep.subr.mxu0 %v383_v1  ;;  %335 = vmatpush3.msra.mxu1 %v120_v3  ;;  %v27_v5 = vld [vmem:[%s478_s0] sm:$0xff]  ;;  %v206_v9 = vld [vmem:[%s483_s5 + $0x18] sm:$0xff]  ;;  %v205_v15 = vld [vmem:[%s483_s5 + $0x10] sm:$0xff] }
   0x4   :  { %328 = vmatpush3.msra.mxu0 %v29_v2  ;;  %336 = vmatprep.subr.mxu1 %v383_v1  ;;  %v117_v8 = vld [vmem:[%s481_s3] sm:$0xff]  ;;  %v204_v16 = vld [vmem:[%s483_s5 + $0x8] sm:$0xff] }
   0x5   :  { %329 = vmatprep.subr.mxu0 %v383_v1  ;;  %342 = vmatprep.mubr.msk.f32.mxu1 %vm384_vm1, %v383_v1  ;;  %v304_v10 = vld [vmem:[%s480_s2] ss:$0 sm:$0xff] }
   0x6   :  { %330 = vmatpush3.msra.mxu0 %v28_v4  ;;  %337 = vmatpush3.msra.mxu1 %v119_v6  ;;  %v203_v17 = vld [vmem:[%s483_s5] sm:$0xff] }
   0x7   :  { %332 = vmatmul.mubr.msk.f32.vlgmr.msra.gmra.mxu0 %vm38_vm2, %v27_v5  ;;  %345 = vmatprep.subr.mxu0 %v383_v1  ;;  %v307_v18 = vld [vmem:[%s482_s4] ss:$0 sm:$0xff] }
   0x8   :  { %353 = vmatprep.mubr.msk.f32.mxu0 %vm384_vm1, %v383_v1  ;;  %338 = vmatprep.subr.mxu1 %v383_v1  ;;  %v309_v23 = vld [vmem:[%s484_s6] ss:$0 sm:$0xff] }
   0x9   :  { %339 = vmatpush3.msra.mxu1 %v118_v7  ;;  %346 = vmatpush3.msra.mxu0 %v206_v9 }
   0xa   :  { %340 = vmatprep.subr.mxu1 %v383_v1  ;;  %347 = vmatprep.subr.mxu0 %v383_v1 }
   0xb   :  { %341 = vmatpush3.msra.mxu1 %v117_v8  ;;  %348 = vmatpush3.msra.mxu0 %v205_v15 }
   0xc   :  { %349 = vmatprep.subr.mxu0 %v383_v1 }
   0xd   :  { %350 = vmatpush3.msra.mxu0 %v204_v16 }
   0xe   :  { %351 = vmatprep.subr.mxu0 %v383_v1 }
   0xf   :  { %352 = vmatpush3.msra.mxu0 %v203_v17 }
  0xc7   :  { %v112_v11 = vpop.f32.mrf.mxu0 }
  0xc8   :  { %v113_v12 = vadd.f32 %v304_v10, %v112_v11 }
  0xc9   :  { %v333_v13 = vpop.f32.mrf.mxu0 }
  0xca   :  { %v116_v14 = vmax.f32 %v113_v12, 0.0 }
  0xcc   :  { %343 = vmatmul.mubr.msk.f32.vlgmr.msra.gmra.mxu1 %vm128_vm3, %v116_v14 }
 0x18c   :  { %v198_v19 = vpop.f32.mrf.mxu1 }
 0x18d   :  { %v199_v20 = vadd.f32 %v307_v18, %v198_v19 }
 0x18e   :  { %v344_v21 = vpop.f32.mrf.mxu1 }
 0x18f   :  { %v202_v22 = vmax.f32 %v199_v20, 0.0 }
 0x191   :  { %354 = vmatmul.mubr.msk.f32.vlgmr.msra.gmra.mxu0 %vm128_vm3, %v202_v22 }
 0x251   :  { %v283_v24 = vpop.f32.mrf.mxu0 }
 0x252   :  { %v284_v25 = vadd.f32 %v309_v23, %v283_v24 }
 0x253   :  { %v355_v26 = vpop.f32.mrf.mxu0 }
 0x254   :  { %287 = vst [vmem:[#allocation2] sm:$0xff] %v284_v25 }
 0x255   :  { %292 = vsyncadd [#allocation3], 96  ;;  %s385_s5 = smov [#allocation2]  }
 0x256   :  { %s293_s27 = sshll.u32 %s385_s5, 4  ;;  %s294_s27 = int_to_ptr.vmem [resolvable:$true] %s293_s27 }
 0x257   :  { %s361_s28 = scalar_lea.vmem %s294_s27, 32  ;;  %s365_s4 = scalar_lea.vmem %s294_s27, 128 }
 0x258   :  { %p362_p0 = scmp.ne.s32.totalorder %s294_s27, %s361_s28  ;;  %p366_p1 = scmp.lt.s32.totalorder %s294_s27, %s294_s27 }
 0x259   :  { %p367_p2 = scmp.lt.s32.totalorder %s365_s4, %s361_s28 }
 0x25b   :  { %p368_p3 = por %p367_p2, %p366_p1 }
 0x25d   :  { %p369_p4 = pnand %p368_p3, %p362_p0 }
 0x25f   :  { %372 = shalt.err (!%p369_p4)
}
 0x260   :  { %s386_s29 = smov 32   ;;  %s387_s30 = smov 2  }
 0x261   :  { %299 = dma.vmem_to_hbm [thread:$0]  %s294_s27, 32, %s485_s7, [#allocation3], %s386_s29, %s386_s29, %s387_s30  }
 0x262   :  { %381 = dma.done.wait [#allocation3], 128  }
 0x263   :  { %382 = vsyncadd [#allocation3], 4294967168 }
 0x264   :  { %303 = vsyncpa [#allocation3], 1 }

</bundles_post_ra>
